<compile_context>
chip_gen: v6e
topology: v6e:2x2x1
jax: 0.10.0
libtpu: 0.0.40
codegen_flags: <defaults>
</compile_context>

<pallas_src>
import functools

import jax
import jax.numpy as jnp
from jax.experimental import pallas as pl
from jax.experimental.pallas import tpu as pltpu


def _localglmnet_kernel(feat_ref, exp_ref,
                        w1_ref, b1_ref, w2_ref, b2_ref,
                        w3_ref, b3_ref, w4_ref, b4_ref,
                        wout_ref, bout_ref,
                        out_ref, *, compute_dtype):
    x = feat_ref[...]                                    # (D, TB) f32
    xc = x.astype(compute_dtype)

    # Hidden stack: tanh(W @ x + b); batch on lanes (N = TB per matmul),
    # accumulation in f32, biases broadcast along the lane (batch) axis.
    h = jnp.tanh(jnp.dot(w1_ref[...], xc,
                         preferred_element_type=jnp.float32) + b1_ref[...])
    h = jnp.tanh(jnp.dot(w2_ref[...], h.astype(compute_dtype),
                         preferred_element_type=jnp.float32) + b2_ref[...])
    h = jnp.tanh(jnp.dot(w3_ref[...], h.astype(compute_dtype),
                         preferred_element_type=jnp.float32) + b3_ref[...])

    # Last hidden layer (no activation): attention weights beta(x), (D, TB).
    beta = jnp.dot(w4_ref[...], h.astype(compute_dtype),
                   preferred_element_type=jnp.float32) + b4_ref[...]

    # Skip connection: per-column dot(beta, x) -> (1, TB)  (sublane reduce, f32).
    skip = jnp.sum(beta * x, axis=0, keepdims=True)

    # Output layer Linear(1, 1) + exp inverse link, scaled by exposure.
    z = skip * wout_ref[0, 0] + bout_ref[0, 0]
    out_ref[...] = jnp.exp(z) * exp_ref[...]


def localglmnet_forward(features, exposure=None, params=None, *,
                        batch_tile=8192, compute_dtype=jnp.bfloat16):
    """features: (B, D) f32, exposure: (B, 1)/(B,) f32 or None, params: dict
    in PyTorch nn.Linear layout (w: (out, in), b: (out,))."""
    B, D = features.shape
    if exposure is None:
        exposure = jnp.ones((B, 1), jnp.float32)

    features = features.astype(jnp.float32)
    exposure = exposure.astype(jnp.float32).reshape(B, 1)

    # Transposed, lane-dense layout: batch on lanes.
    feat_t = features.T          # (D, B)
    exp_t = exposure.T           # (1, B)

    if B <= batch_tile:
        tb, b_pad = B, B
    else:
        assert batch_tile % 128 == 0, "batch_tile must be a multiple of 128"
        tb = batch_tile
        b_pad = pl.cdiv(B, tb) * tb
        if b_pad != B:
            feat_t = jnp.pad(feat_t, ((0, 0), (0, b_pad - B)))
            exp_t = jnp.pad(exp_t, ((0, 0), (0, b_pad - B)))
    grid = (b_pad // tb,)

    # Weights in PyTorch layout (out, in). Pad hidden dim 30 -> 32 (exact:
    # padded units contribute tanh(0)=0 and zero w4 columns). Biases reshaped
    # to (out, 1) so they broadcast along the lane (batch) axis in-kernel.
    h3 = params["w3"].shape[0]                 # 30
    h3p = ((h3 + 7) // 8) * 8                  # 32
    w1 = params["w1"]
    w2 = params["w2"]
    w3 = jnp.pad(params["w3"], ((0, h3p - h3), (0, 0)))
    w4 = jnp.pad(params["w4"], ((0, 0), (0, h3p - h3)))
    b1 = params["b1"].reshape(-1, 1).astype(jnp.float32)
    b2 = params["b2"].reshape(-1, 1).astype(jnp.float32)
    b3 = jnp.pad(params["b3"], (0, h3p - h3)).reshape(-1, 1).astype(jnp.float32)
    b4 = params["b4"].reshape(-1, 1).astype(jnp.float32)
    w_out = params["w_out"].reshape(1, 1).astype(jnp.float32)
    b_out = params["b_out"].reshape(1, 1).astype(jnp.float32)

    # Cast matmul weights once on the host so the VMEM-resident copies are
    # already in the MXU input dtype (no per-grid-step casts, half the DMA).
    w1 = w1.astype(compute_dtype)
    w2 = w2.astype(compute_dtype)
    w3 = w3.astype(compute_dtype)
    w4 = w4.astype(compute_dtype)

    def resident(arr):
        # Full-extent block, constant index map -> fetched once, stays in VMEM.
        return pl.BlockSpec(arr.shape, lambda i: (0, 0))

    smem_scalar = pl.BlockSpec((1, 1), lambda i: (0, 0),
                               memory_space=pltpu.MemorySpace.SMEM)

    h1, h2 = w1.shape[0], w2.shape[0]
    flops = 2 * B * (D * h1 + h1 * h2 + h2 * h3p + h3p * D + D) + 2 * B
    transcendentals = B * (h1 + h2 + h3p + 1)
    bytes_accessed = (4 * B * (D + 2)
                      + w1.size * w1.dtype.itemsize + w2.size * w2.dtype.itemsize
                      + w3.size * w3.dtype.itemsize + w4.size * w4.dtype.itemsize
                      + 4 * (h1 + h2 + h3p + D + 2))

    out_t = pl.pallas_call(
        functools.partial(_localglmnet_kernel, compute_dtype=compute_dtype),
        out_shape=jax.ShapeDtypeStruct((1, b_pad), jnp.float32),
        grid=grid,
        in_specs=[
            pl.BlockSpec((D, tb), lambda i: (0, i)),    # features (D, B_pad)
            pl.BlockSpec((1, tb), lambda i: (0, i)),    # exposure (1, B_pad)
            resident(w1), resident(b1),
            resident(w2), resident(b2),
            resident(w3), resident(b3),
            resident(w4), resident(b4),
            smem_scalar, smem_scalar,                   # w_out, b_out scalars
        ],
        out_specs=pl.BlockSpec((1, tb), lambda i: (0, i)),
        compiler_params=pltpu.CompilerParams(
            dimension_semantics=("parallel",)),
        cost_estimate=pl.CostEstimate(
            flops=int(flops),
            transcendentals=int(transcendentals),
            bytes_accessed=int(bytes_accessed)),
    )(feat_t, exp_t, w1, b1, w2, b2, w3, b3, w4, b4, w_out, b_out)

    return out_t[:, :B].T        # (B, 1)


def init_params(key, input_size):
    """Deterministic synthetic init, PyTorch nn.Linear layout (out, in)."""
    dims = [(input_size, 80), (80, 40), (40, 30), (30, input_size)]
    params = {}
    for idx, (fan_in, fan_out) in enumerate(dims, start=1):
        key, kw, kb = jax.random.split(key, 3)
        bound = 1.0 / float(fan_in) ** 0.5
        params[f"w{idx}"] = jax.random.uniform(
            kw, (fan_out, fan_in), jnp.float32, -bound, bound)
        params[f"b{idx}"] = jax.random.uniform(
            kb, (fan_out,), jnp.float32, -bound, bound)
    key, kw, kb = jax.random.split(key, 3)
    params["w_out"] = jax.random.uniform(kw, (1, 1), jnp.float32, -1.0, 1.0)
    params["b_out"] = jax.random.uniform(kb, (1,), jnp.float32, -1.0, 1.0)
    return params


def reference_forward(features, exposure, params):
    """Plain-JAX reference mirroring the PyTorch module (f32 throughout)."""
    x = features
    x = jnp.tanh(x @ params["w1"].T + params["b1"])
    x = jnp.tanh(x @ params["w2"].T + params["b2"])
    x = jnp.tanh(x @ params["w3"].T + params["b3"])
    beta = x @ params["w4"].T + params["b4"]
    skip = jnp.sum(beta * features, axis=-1, keepdims=True)
    z = skip * params["w_out"][0, 0] + params["b_out"][0]
    return jnp.exp(z) * exposure


if __name__ == "__main__":
    D = 16                     # input_size
    B = 384                    # small batch; batch_tile=128 -> 3 grid steps
    key = jax.random.PRNGKey(0)
    key, kf, ke = jax.random.split(key, 3)

    features = jax.random.normal(kf, (B, D), jnp.float32)
    exposure = jax.random.uniform(ke, (B, 1), jnp.float32, 0.5, 1.5)
    params = init_params(key, D)

    ref = reference_forward(features, exposure, params)

    # Full-f32 compute path: tight correctness check.
    out_f32 = localglmnet_forward(features, exposure, params,
                                  batch_tile=128, compute_dtype=jnp.float32)
    out_f32 = jax.block_until_ready(out_f32)
    assert out_f32.shape == (B, 1)
    assert jnp.allclose(out_f32, ref, rtol=1e-3, atol=1e-4), (
        "f32 max abs err = %s" % float(jnp.max(jnp.abs(out_f32 - ref))))

    # bf16 matmul-input fast path (default on v6e/v7x): loose sanity check.
    out_bf16 = localglmnet_forward(features, exposure, params,
                                   batch_tile=128, compute_dtype=jnp.bfloat16)
    out_bf16 = jax.block_until_ready(out_bf16)
    assert out_bf16.shape == (B, 1)
    assert bool(jnp.all(jnp.isfinite(out_bf16)))
    assert jnp.allclose(out_bf16, ref, rtol=2e-1, atol=2e-1)

    # TODO(synk): the `attentions=True` early-return path (returning beta) is
    # not exposed; only the standard forward output is implemented.
    print("KERNEL_OK")
</pallas_src>

<mosaic_0001>
module attributes {stable_mosaic.version = 11 : i64} {
  func.func @_localglmnet_kernel(%arg0: i32, %arg1: memref<16x128xf32, #tpu.memory_space<vmem>>, %arg2: memref<1x128xf32, #tpu.memory_space<vmem>>, %arg3: memref<80x16xf32, #tpu.memory_space<vmem>>, %arg4: memref<80x1xf32, #tpu.memory_space<vmem>>, %arg5: memref<40x80xf32, #tpu.memory_space<vmem>>, %arg6: memref<40x1xf32, #tpu.memory_space<vmem>>, %arg7: memref<32x40xf32, #tpu.memory_space<vmem>>, %arg8: memref<32x1xf32, #tpu.memory_space<vmem>>, %arg9: memref<16x32xf32, #tpu.memory_space<vmem>>, %arg10: memref<16x1xf32, #tpu.memory_space<vmem>>, %arg11: memref<1x1xf32, #tpu.memory_space<smem>>, %arg12: memref<1x1xf32, #tpu.memory_space<smem>>, %arg13: memref<1x128xf32, #tpu.memory_space<vmem>>) attributes {dimension_semantics = [#tpu.dimension_semantics<parallel>], iteration_bounds = array<i64: 3>, scalar_prefetch = 0 : i64, scratch_operands = 0 : i64, tpu.core_type = #tpu.core_type<tc>, window_params = [{transform_indices = @transform_0, window_bounds = array<i64: 16, 128>}, {transform_indices = @transform_1, window_bounds = array<i64: 1, 128>}, {pipeline_mode = #tpu.pipeline_mode<synchronous>, transform_indices = @transform_2, window_bounds = array<i64: 80, 16>}, {pipeline_mode = #tpu.pipeline_mode<synchronous>, transform_indices = @transform_3, window_bounds = array<i64: 80, 1>}, {pipeline_mode = #tpu.pipeline_mode<synchronous>, transform_indices = @transform_4, window_bounds = array<i64: 40, 80>}, {pipeline_mode = #tpu.pipeline_mode<synchronous>, transform_indices = @transform_5, window_bounds = array<i64: 40, 1>}, {pipeline_mode = #tpu.pipeline_mode<synchronous>, transform_indices = @transform_6, window_bounds = array<i64: 32, 40>}, {pipeline_mode = #tpu.pipeline_mode<synchronous>, transform_indices = @transform_7, window_bounds = array<i64: 32, 1>}, {pipeline_mode = #tpu.pipeline_mode<synchronous>, transform_indices = @transform_8, window_bounds = array<i64: 16, 32>}, {pipeline_mode = #tpu.pipeline_mode<synchronous>, transform_indices = @transform_9, window_bounds = array<i64: 16, 1>}, {transform_indices = @transform_10, window_bounds = array<i64: 1, 1>}, {transform_indices = @transform_11, window_bounds = array<i64: 1, 1>}, {transform_indices = @transform_12, window_bounds = array<i64: 1, 128>}]} {
    %c0 = arith.constant 0 : index
    %c0_0 = arith.constant 0 : index
    %0 = vector.load %arg1[%c0, %c0_0] : memref<16x128xf32, #tpu.memory_space<vmem>>, vector<16x128xf32>
    %c0_1 = arith.constant 0 : index
    %c0_2 = arith.constant 0 : index
    %1 = vector.load %arg3[%c0_1, %c0_2] : memref<80x16xf32, #tpu.memory_space<vmem>>, vector<80x16xf32>
    %cst = arith.constant dense<0.000000e+00> : vector<80x128xf32>
    %2 = tpu.matmul %1, %0, %cst {dimension_numbers = #tpu.dot_dimension_numbers<[1], [0], [0], [1], [0, 0, 1, 1], [], []>} : vector<80x16xf32>, vector<16x128xf32>, vector<80x128xf32> -> vector<80x128xf32>
    %c0_3 = arith.constant 0 : index
    %c0_4 = arith.constant 0 : index
    %3 = vector.load %arg4[%c0_3, %c0_4] : memref<80x1xf32, #tpu.memory_space<vmem>>, vector<80x1xf32>
    %4 = vector.broadcast %3 : vector<80x1xf32> to vector<80x128xf32>
    %5 = arith.addf %2, %4 : vector<80x128xf32>
    %6 = math.tanh %5 : vector<80x128xf32>
    %c0_5 = arith.constant 0 : index
    %c0_6 = arith.constant 0 : index
    %7 = vector.load %arg5[%c0_5, %c0_6] : memref<40x80xf32, #tpu.memory_space<vmem>>, vector<40x80xf32>
    %cst_7 = arith.constant dense<0.000000e+00> : vector<40x128xf32>
    %8 = tpu.matmul %7, %6, %cst_7 {dimension_numbers = #tpu.dot_dimension_numbers<[1], [0], [0], [1], [0, 0, 1, 1], [], []>} : vector<40x80xf32>, vector<80x128xf32>, vector<40x128xf32> -> vector<40x128xf32>
    %c0_8 = arith.constant 0 : index
    %c0_9 = arith.constant 0 : index
    %9 = vector.load %arg6[%c0_8, %c0_9] : memref<40x1xf32, #tpu.memory_space<vmem>>, vector<40x1xf32>
    %10 = vector.broadcast %9 : vector<40x1xf32> to vector<40x128xf32>
    %11 = arith.addf %8, %10 : vector<40x128xf32>
    %12 = math.tanh %11 : vector<40x128xf32>
    %c0_10 = arith.constant 0 : index
    %c0_11 = arith.constant 0 : index
    %13 = vector.load %arg7[%c0_10, %c0_11] : memref<32x40xf32, #tpu.memory_space<vmem>>, vector<32x40xf32>
    %cst_12 = arith.constant dense<0.000000e+00> : vector<32x128xf32>
    %14 = tpu.matmul %13, %12, %cst_12 {dimension_numbers = #tpu.dot_dimension_numbers<[1], [0], [0], [1], [0, 0, 1, 1], [], []>} : vector<32x40xf32>, vector<40x128xf32>, vector<32x128xf32> -> vector<32x128xf32>
    %c0_13 = arith.constant 0 : index
    %c0_14 = arith.constant 0 : index
    %15 = vector.load %arg8[%c0_13, %c0_14] : memref<32x1xf32, #tpu.memory_space<vmem>>, vector<32x1xf32>
    %16 = vector.broadcast %15 : vector<32x1xf32> to vector<32x128xf32>
    %17 = arith.addf %14, %16 : vector<32x128xf32>
    %18 = math.tanh %17 : vector<32x128xf32>
    %c0_15 = arith.constant 0 : index
    %c0_16 = arith.constant 0 : index
    %19 = vector.load %arg9[%c0_15, %c0_16] : memref<16x32xf32, #tpu.memory_space<vmem>>, vector<16x32xf32>
    %cst_17 = arith.constant dense<0.000000e+00> : vector<16x128xf32>
    %20 = tpu.matmul %19, %18, %cst_17 {dimension_numbers = #tpu.dot_dimension_numbers<[1], [0], [0], [1], [0, 0, 1, 1], [], []>} : vector<16x32xf32>, vector<32x128xf32>, vector<16x128xf32> -> vector<16x128xf32>
    %c0_18 = arith.constant 0 : index
    %c0_19 = arith.constant 0 : index
    %21 = vector.load %arg10[%c0_18, %c0_19] : memref<16x1xf32, #tpu.memory_space<vmem>>, vector<16x1xf32>
    %22 = vector.broadcast %21 : vector<16x1xf32> to vector<16x128xf32>
    %23 = arith.addf %20, %22 : vector<16x128xf32>
    %24 = arith.mulf %23, %0 : vector<16x128xf32>
    %cst_20 = arith.constant dense<0.000000e+00> : vector<128xf32>
    %25 = vector.multi_reduction <add>, %24, %cst_20 [0] : vector<16x128xf32> to vector<128xf32>
    %26 = vector.shape_cast %25 : vector<128xf32> to vector<1x128xf32>
    %c0_21 = arith.constant 0 : index
    %c0_22 = arith.constant 0 : index
    %27 = memref.load %arg11[%c0_21, %c0_22] : memref<1x1xf32, #tpu.memory_space<smem>>
    %28 = vector.broadcast %27 : f32 to vector<1x128xf32>
    %29 = arith.mulf %26, %28 : vector<1x128xf32>
    %c0_23 = arith.constant 0 : index
    %c0_24 = arith.constant 0 : index
    %30 = memref.load %arg12[%c0_23, %c0_24] : memref<1x1xf32, #tpu.memory_space<smem>>
    %31 = vector.broadcast %30 : f32 to vector<1x128xf32>
    %32 = arith.addf %29, %31 : vector<1x128xf32>
    %33 = math.exp %32 : vector<1x128xf32>
    %c0_25 = arith.constant 0 : index
    %c0_26 = arith.constant 0 : index
    %34 = vector.load %arg2[%c0_25, %c0_26] : memref<1x128xf32, #tpu.memory_space<vmem>>, vector<1x128xf32>
    %35 = arith.mulf %33, %34 : vector<1x128xf32>
    %c0_27 = arith.constant 0 : index
    %c0_28 = arith.constant 0 : index
    %36 = vector.load %arg13[%c0_27, %c0_28] : memref<1x128xf32, #tpu.memory_space<vmem>>, vector<1x128xf32>
    tpu.vector_store %arg13[%c0_27, %c0_28], %35 {strides = array<i32>} : memref<1x128xf32, #tpu.memory_space<vmem>>, vector<1x128xf32>,
    return
  }
  func.func @transform_0(%arg0: i32) -> (i32, i32) {
    %c0_i32 = arith.constant 0 : i32
    %c0_i32_0 = arith.constant 0 : i32
    return %c0_i32, %arg0 : i32, i32
  }
  func.func @transform_1(%arg0: i32) -> (i32, i32) {
    %c0_i32 = arith.constant 0 : i32
    %c0_i32_0 = arith.constant 0 : i32
    return %c0_i32, %arg0 : i32, i32
  }
  func.func @transform_2(%arg0: i32) -> (i32, i32) {
    %c0_i32 = arith.constant 0 : i32
    %c0_i32_0 = arith.constant 0 : i32
    %c0_i32_1 = arith.constant 0 : i32
    return %c0_i32, %c0_i32_0 : i32, i32
  }
  func.func @transform_3(%arg0: i32) -> (i32, i32) {
    %c0_i32 = arith.constant 0 : i32
    %c0_i32_0 = arith.constant 0 : i32
    %c0_i32_1 = arith.constant 0 : i32
    return %c0_i32, %c0_i32_0 : i32, i32
  }
  func.func @transform_4(%arg0: i32) -> (i32, i32) {
    %c0_i32 = arith.constant 0 : i32
    %c0_i32_0 = arith.constant 0 : i32
    %c0_i32_1 = arith.constant 0 : i32
    return %c0_i32, %c0_i32_0 : i32, i32
  }
  func.func @transform_5(%arg0: i32) -> (i32, i32) {
    %c0_i32 = arith.constant 0 : i32
    %c0_i32_0 = arith.constant 0 : i32
    %c0_i32_1 = arith.constant 0 : i32
    return %c0_i32, %c0_i32_0 : i32, i32
  }
  func.func @transform_6(%arg0: i32) -> (i32, i32) {
    %c0_i32 = arith.constant 0 : i32
    %c0_i32_0 = arith.constant 0 : i32
    %c0_i32_1 = arith.constant 0 : i32
    return %c0_i32, %c0_i32_0 : i32, i32
  }
  func.func @transform_7(%arg0: i32) -> (i32, i32) {
    %c0_i32 = arith.constant 0 : i32
    %c0_i32_0 = arith.constant 0 : i32
    %c0_i32_1 = arith.constant 0 : i32
    return %c0_i32, %c0_i32_0 : i32, i32
  }
  func.func @transform_8(%arg0: i32) -> (i32, i32) {
    %c0_i32 = arith.constant 0 : i32
    %c0_i32_0 = arith.constant 0 : i32
    %c0_i32_1 = arith.constant 0 : i32
    return %c0_i32, %c0_i32_0 : i32, i32
  }
  func.func @transform_9(%arg0: i32) -> (i32, i32) {
    %c0_i32 = arith.constant 0 : i32
    %c0_i32_0 = arith.constant 0 : i32
    %c0_i32_1 = arith.constant 0 : i32
    return %c0_i32, %c0_i32_0 : i32, i32
  }
  func.func @transform_10(%arg0: i32) -> (i32, i32) {
    %c0_i32 = arith.constant 0 : i32
    %c0_i32_0 = arith.constant 0 : i32
    %c0_i32_1 = arith.constant 0 : i32
    return %c0_i32, %c0_i32_0 : i32, i32
  }
  func.func @transform_11(%arg0: i32) -> (i32, i32) {
    %c0_i32 = arith.constant 0 : i32
    %c0_i32_0 = arith.constant 0 : i32
    %c0_i32_1 = arith.constant 0 : i32
    return %c0_i32, %c0_i32_0 : i32, i32
  }
  func.func @transform_12(%arg0: i32) -> (i32, i32) {
    %c0_i32 = arith.constant 0 : i32
    %c0_i32_0 = arith.constant 0 : i32
    return %c0_i32, %arg0 : i32, i32
  }
}

</mosaic_0001>

<bundles_post_ra>
// kernel: tpu_custom_call.1
= control target key start
LH: loop header
LB: loop body
LE: loop exit
PB: predicated region body
PF: predicated region fallthrough
CT: control target
= control target key end

     0   :  { %s1820_s0 = inlined_call_operand.vmem [shape: f32[16,384], index: 0, kind: input, shape index: {}]   ;;  %s1821_s1 = inlined_call_operand.vmem [shape: f32[1,384], index: 1, kind: input, shape index: {}]   ;;  %s1822_s2 = inlined_call_operand.vmem [shape: f32[80,16], index: 2, kind: input, shape index: {}]   ;;  %s1823_s3 = inlined_call_operand.vmem [shape: f32[80,1], index: 3, kind: input, shape index: {}]   ;;  %s1824_s4 = inlined_call_operand.vmem [shape: f32[40,80], index: 4, kind: input, shape index: {}]   ;;  %s1825_s5 = inlined_call_operand.vmem [shape: f32[40,1], index: 5, kind: input, shape index: {}]   ;;  %s1826_s6 = inlined_call_operand.vmem [shape: f32[32,40], index: 6, kind: input, shape index: {}]   ;;  %s1827_s7 = inlined_call_operand.vmem [shape: f32[32,1], index: 7, kind: input, shape index: {}]   ;;  %s1828_s8 = inlined_call_operand.vmem [shape: f32[16,32], index: 8, kind: input, shape index: {}]   ;;  %s1829_s9 = inlined_call_operand.vmem [shape: f32[16,1], index: 9, kind: input, shape index: {}]   ;;  %s1830_s10 = inlined_call_operand.<no memory space> [shape: f32[1,1], index: 10, kind: input, shape index: {}]   ;;  %s1831_s11 = inlined_call_operand.<no memory space> [shape: f32[1,1], index: 11, kind: input, shape index: {}]   ;;  %s1832_s12 = inlined_call_operand.hbm [shape: f32[1,384], index: 12, kind: output, shape index: {}]  }
   0x1   :  { %1833 = sst [smem:[#allocation8_spill]] %s1820_s0 }
   0x2   :  { %1834 = sst [smem:[#allocation9_spill]] %s1822_s2 }
   0x3   :  { %17 = sst [smem:[#allocation2]] %s1830_s10 }
   0x4   :  { %18 = sst [smem:[#allocation3]] %s1831_s11 }
   0x5   :  { %19 = vsyncpa [#allocation6], 0 }
   0x6   :  { %21 = vsyncpa [#allocation6 + $0x1], 0  ;;  %s1544_s25 = smov 0   ;;  %s1546_s26 = smov 0  }
   0x7   :  { %s1548_s27 = smov 0   ;;  %s1550_s28 = smov 0  }
   0x8 LB: > { %s1565_s10 = sadd.s32 4294967295, %s1467_s28   ;;  %s1169_s11 = sadd.s32 4294967294, %s1467_s28   ;;  %s1467_s28 = sphi %s1550_s28, %s1842_s28   ;;  %s1463_s27 = sphi %s1548_s27, %s1841_s27   ;;  %s1459_s26 = sphi %s1546_s26, %s1840_s26   ;;  %s1455_s25 = sphi %s1544_s25, %s1839_s25  }
   0x9   : > { %s1569_s29 = sadd.s32 1, %s1467_s28   ;;  %s34_s30 = sadd.s32 1, %s1463_s27 }
   0xa   : > { %s31_s13 = ssub.s32 %s1467_s28, %s1569_s29  ;;  %p41_p0 = scmp.ne.s32.totalorder %s1463_s27, %s1459_s26 }
   0xb   : > { %p32_p1 = scmp.eq.s32.totalorder %s31_s13, 0  ;;  %p42_p2 = scmp.eq.s32.totalorder %s1467_s28, 0 }
   0xc   : > { %p307_p3 = scmp.eq.s32.totalorder %s1565_s10, 2  ;;  %p312_p4 = scmp.ne.s32.totalorder %s1459_s26, %s1455_s25 }
   0xd   : > { %s1581_s14 = scalar_select %p32_p1, %s1463_s27, %s34_s30  }
   0xe   : > { %p43_p5 = por %p42_p2, %p41_p0  ;;  %p1583_p6 = por %p307_p3, %p41_p0 }
   0xf   : > { %p313_p7 = scmp.eq.s32.totalorder %s1169_s11, 2  ;;  %p1171_p9 = scmp.ge.s32.totalorder %s1467_s28, 3 }
  0x11   : > { %p1587_p8 = por %p313_p7, %p312_p4  ;;  %359 = sbr.rel (%p1171_p9) target bundleno = 33 (0x21), region = 56 }
  0x16   : > { %362 = sbr.rel (!%p43_p5) target bundleno = 33 (0x21), region = 60  ;;  %s364_s17 = sand.u32 (%p43_p5), 1, %s1463_s27  }
  0x17   : > { %s1173_s18 = sshll.u32 (%p43_p5), %s1467_s28, 3  ;;  %s1172_s19 = sshll.u32 (%p43_p5), %s364_s17, 4 }
  0x18   : > { %s1837_s0 = sld [smem:[#allocation8_spill]] (%p43_p5)  ;;  %s366_s23 = scalar_lea.vmem (%p43_p5), [#allocation4], %s1172_s19 }
  0x1e   : > { %s368_s22 = scalar_lea.vmem %s1837_s0, %s1173_s18 }
  0x1f   : > { %v399_v0 = vld [vmem:[%s368_s22] sm:$0xff]  ;;  %v401_v1 = vld [vmem:[%s368_s22 + $0x18] sm:$0xff] }
  0x20   : > { %400 = vst [vmem:[%s366_s23] sm:$0xff] %v399_v0  ;;  %402 = vst [vmem:[%s366_s23 + $0x8] sm:$0xff] %v401_v1 }
  0x21 PF: > { %p1174_p10 = scmp.ge.s32.totalorder %s1467_s28, 1  ;;  %p413_p11 = scmp.lt.s32.totalorder %s1467_s28, 4 }
  0x23   : > { %p414_p12 = pnand %p1174_p10, %p413_p11 }
  0x24   : > { %s1600_s24 = sand.u32 (!%p414_p12), 1, %s1459_s26   ;;  %s1838_s2 = sld [smem:[#allocation9_spill]] (!%p414_p12) }
  0x25   : > { %417 = sbr.rel (%p414_p12) target bundleno = 996 (0x3e4), region = 102  ;;  %s1175_s13 = sshll.u32 (!%p414_p12), %s1600_s24, 4 }
  0x26   : > { %s422_s17 = scalar_lea.vmem (!%p414_p12), [#allocation4], %s1175_s13  ;;  %s1075_s20 = sld [smem:[#allocation2]] (!%p414_p12) }
  0x27   : > { %s1078_s21 = sld [smem:[#allocation3]] (!%p414_p12)  ;;  %p463_p13 = scmp.lt.s32.totalorder (!%p414_p12), %s1565_s10, 2 }
  0x28   : > { %s1197_s13 = sshll.u32 (!%p414_p12), %s1565_s10, 4  ;;  %s1087_s0 = scalar_lea.sflag (!%p414_p12), [#allocation6], %s1600_s24 }
  0x29   : > { %s1472_s23 = smov (!%p414_p12), [#allocation5]  }
  0x2a   : > { %v468_v2 = vld [vmem:[%s1838_s2] sm:$0xff]  ;;  %vm538_vm0 = vcmask 130048   ;;  %v1469_v3 = vmov 0   ;;  %v1607_v4 = vld [vmem:[%s422_s17 + $0x8] sm:$0xff]  ;;  %v470_v9 = vld [vmem:[%s1838_s2 + $0x10] sm:$0xff]  ;;  %v1470_v36 = vmov 0.0  }
  0x2b   : > { %1246 = vmatprep.mubr.msk.f32.mxu0 %vm538_vm0, %v468_v2  ;;  %1365 = vset.pattern.permute.xlu0 %v1469_v3  ;;  %v1609_v5 = vld [vmem:[%s422_s17] sm:$0xff]  ;;  %v487_v6 = vld [vmem:[%s1823_s3 + $0x48] sm:$0xff]  ;;  %v485_v7 = vld [vmem:[%s1823_s3 + $0x38] sm:$0xff]  ;;  %vm1471_vm1 = vmmov 0   ;;  %vm729_vm2 = vcmask 654336   ;;  %vm868_vm3 = vcmask 326656  }
  0x2c   : > { %1366 = vset.pattern.permute.xlu1 %v1469_v3  ;;  %1242 = vmatprep.subr.mxu0 %v1607_v4  ;;  %v469_v8 = vld [vmem:[%s1838_s2 + $0x8] sm:$0xff]  ;;  %v486_v10 = vld [vmem:[%s1823_s3 + $0x40] sm:$0xff]  ;;  %v484_v11 = vld [vmem:[%s1823_s3 + $0x30] sm:$0xff]  ;;  %vm984_vm4 = vcmask 261120   ;;  %s464_s22 = scalar_select %p463_p13, %s1565_s10, 2 }
  0x2d   : > { %1243 = vmatpush3.msra.mxu0 %v1607_v4  ;;  %535 = vperm.xlu0 %1365, %v487_v6   ;;  %v471_v12 = vld [vmem:[%s1838_s2 + $0x18] sm:$0xff]  ;;  %v472_v13 = vld [vmem:[%s1838_s2 + $0x20] sm:$0xff]  ;;  %v483_v14 = vld [vmem:[%s1823_s3 + $0x28] sm:$0xff]  ;;  %s462_s17 = scalar_lea.vmem [#allocation5], %s1600_s24 }
  0x2e   : > { %1244 = vmatprep.subr.mxu0 %v1609_v5  ;;  %525 = vperm.xlu1 %1366, %v485_v7   ;;  %v482_v15 = vld [vmem:[%s1823_s3 + $0x20] sm:$0xff]  ;;  %v473_v16 = vld [vmem:[%s1838_s2 + $0x28] sm:$0xff]  ;;  %v474_v17 = vld [vmem:[%s1838_s2 + $0x30] sm:$0xff]  ;;  %s465_s30 = scalar_lea.vmem %s1821_s1, %s464_s22  ;;  %s1099_s18 = sshll.u32 %s462_s17, 4  ;;  %s1100_s18 = int_to_ptr.vmem [resolvable:$true] %s1099_s18 }
  0x2f   : > { %1245 = vmatpush3.msra.mxu0 %v1609_v5  ;;  %v481_v18 = vld [vmem:[%s1823_s3 + $0x18] sm:$0xff]  ;;  %v480_v19 = vld [vmem:[%s1823_s3 + $0x10] sm:$0xff]  ;;  %v476_v21 = vld [vmem:[%s1838_s2 + $0x40] sm:$0xff]  ;;  %1261 = vmatprep.subr.mxu1 %v1470_v36  ;;  %s1411_s22 = sshll.u32 %s1472_s23, 4  ;;  %s1412_s22 = int_to_ptr.vmem [resolvable:$false] %s1411_s22 }
  0x30   : > { %1247 = vmatmul.mubr.msk.f32.vlgmr.msra.gmra.mxu0 %vm538_vm0, %v469_v8  ;;  %v475_v20 = vld [vmem:[%s1838_s2 + $0x38] sm:$0xff]  ;;  %v479_v22 = vld [vmem:[%s1823_s3 + $0x8] sm:$0xff]  ;;  %v478_v23 = vld [vmem:[%s1823_s3] sm:$0xff]  ;;  %1281 = vmatprep.mubr.msk.f32.mxu1 %vm1471_vm1, %v1470_v36  ;;  %s1413_s10 = scalar_lea.vmem %s1412_s22, 32  ;;  %p1414_p3 = scmp.lt.s32.totalorder %s1100_s18, %s1412_s22 }
  0x31   : > { %1249 = vmatprep.mubr.msk.f32.mxu0 %vm538_vm0, %v470_v9  ;;  %530 = vperm.xlu0 %1365, %v486_v10   ;;  %v477_v24 = vld [vmem:[%s1838_s2 + $0x48] sm:$0xff]  ;;  %v703_v25 = vld [vmem:[%s1825_s5 + $0x20] sm:$0xff]  ;;  %v702_v26 = vld [vmem:[%s1825_s5 + $0x18] sm:$0xff]  ;;  %s1407_s2 = scalar_lea.vmem %s1100_s18, 16 }
  0x32   : > { %520 = vperm.xlu1 %1366, %v484_v11   ;;  %v701_v27 = vld [vmem:[%s1825_s5 + $0x10] sm:$0xff]  ;;  %v700_v28 = vld [vmem:[%s1825_s5 + $0x8] sm:$0xff]  ;;  %v699_v29 = vld [vmem:[%s1825_s5] sm:$0xff]  ;;  %p1408_p0 = scmp.ne.s32.totalorder %s1100_s18, %s1407_s2  ;;  %p1415_p4 = scmp.lt.s32.totalorder %s1413_s10, %s1407_s2 }
  0x33   : > { %v847_v30 = vld [vmem:[%s1827_s7 + $0x18] sm:$0xff]  ;;  %v846_v31 = vld [vmem:[%s1827_s7 + $0x10] sm:$0xff]  ;;  %v845_v32 = vld [vmem:[%s1827_s7 + $0x8] sm:$0xff] }
  0x34   : > { %1250 = vmatmul.mubr.msk.f32.gmra.mxu0 %vm538_vm0, %v471_v12  ;;  %v844_v33 = vld [vmem:[%s1827_s7] sm:$0xff]  ;;  %v973_v35 = vld [vmem:[%s1829_s9 + $0x8] sm:$0xff]  ;;  %p1409_p1 = pnand %p1408_p0, %p1583_p6  ;;  %p1416_p5 = por %p1415_p4, %p1414_p3 }
  0x35   : > { %1252 = vmatprep.mubr.msk.f32.mxu0 %vm538_vm0, %v472_v13  ;;  %515 = vperm.xlu0 %1365, %v483_v14   ;;  %v972_v34 = vld [vmem:[%s1829_s9] sm:$0xff] }
  0x36   : > { %510 = vperm.xlu1 %1366, %v482_v15   ;;  %v694_v14 = vld [vmem:[%s1824_s4] sm:$0xff]  ;;  %p1410_p2 = pneg %p1409_p1 }
  0x38   : > { %1253 = vmatmul.mubr.msk.f32.gmra.mxu0 %vm538_vm0, %v473_v16  ;;  %v695_v16 = vld [vmem:[%s1824_s4 + $0x8] sm:$0xff]  ;;  %p1417_p7 = pnand %p1416_p5, %p1410_p2 }
  0x39   : > { %1255 = vmatprep.mubr.msk.f32.mxu0 %vm538_vm0, %v474_v17  ;;  %505 = vperm.xlu0 %1365, %v481_v18   ;;  %v696_v17 = vld [vmem:[%s1824_s4 + $0x10] sm:$0xff]  ;;  %v697_v18 = vld [vmem:[%s1824_s4 + $0x18] sm:$0xff] }
  0x3a   : > { %500 = vperm.xlu1 %1366, %v480_v19   ;;  %v698_v19 = vld [vmem:[%s1824_s4 + $0x20] sm:$0xff] }
  0x3c   : > { %1256 = vmatmul.mubr.msk.f32.gmra.mxu0 %vm538_vm0, %v475_v20  ;;  %v840_v20 = vld [vmem:[%s1826_s6] sm:$0xff] }
  0x3d   : > { %1258 = vmatprep.mubr.msk.f32.mxu0 %vm538_vm0, %v476_v21  ;;  %495 = vperm.xlu0 %1365, %v479_v22  }
  0x3e   : > { %490 = vperm.xlu1 %1366, %v478_v23  }
  0x40   : > { %1259 = vmatmul.mubr.msk.f32.gmra.mxu0 %vm538_vm0, %v477_v24 }
  0x41   : > { %726 = vperm.xlu0 %1365, %v703_v25   ;;  %1306 = vmatprep.mubr.msk.f32.mxu0 %vm868_vm3, %v840_v20 }
  0x42   : > { %721 = vperm.xlu1 %1366, %v702_v26  }
  0x45   : > { %716 = vperm.xlu0 %1365, %v701_v27  }
  0x46   : > { %711 = vperm.xlu1 %1366, %v700_v28  }
  0x49   : > { %706 = vperm.xlu0 %1365, %v699_v29  }
  0x4a   : > { %865 = vperm.xlu1 %1366, %v847_v30  }
  0x4d   : > { %860 = vperm.xlu0 %1365, %v846_v31  }
  0x4e   : > { %855 = vperm.xlu1 %1366, %v845_v32  }
  0x51   : > { %850 = vperm.xlu0 %1365, %v844_v33  }
  0x52   : > { %976 = vperm.xlu1 %1366, %v972_v34  }
  0x55   : > { %981 = vperm.xlu0 %1365, %v973_v35  }
  0xa8   : > { %v536_v40 = vpop.permute.xlu0 %535 }
  0xa9   : > { %v526_v42 = vpop.permute.xlu1 %525 }
  0xac   : > { %v531_v45 = vpop.permute.xlu0 %530 }
  0xad   : > { %v521_v47 = vpop.permute.xlu1 %520 }
  0xb0   : > { %v516_v51 = vpop.permute.xlu0 %515 }
  0xb1   : > { %v511_v55 = vpop.permute.xlu1 %510 }
  0xb4   : > { %v506_v58 = vpop.permute.xlu0 %505 }
  0xb5   : > { %v501_v60 = vpop.permute.xlu1 %500 }
  0xb8   : > { %v496_v63 = vpop.permute.xlu0 %495 }
  0xb9   : > { %v491_v2 = vpop.permute.xlu1 %490 }
  0xbc   : > { %v727_v26 = vpop.permute.xlu0 %726 }
  0xbd   : > { %v722_v29 = vpop.permute.xlu1 %721 }
  0xc0   : > { %v717_v31 = vpop.permute.xlu0 %716 }
  0xf0   : > { %v1248_v37 = vpop.f32.mrf.mxu0 }
  0xf1   : > { %v641_v0 = vadd.f32 %v1248_v37, %v496_v63  ;;  %v712_v37 = vpop.permute.xlu1 %711 }
  0xf2   : > { %v635_v38 = vpop.f32.mrf.mxu0 }
  0xf3   : > { %v636_v3 = vadd.f32 %v635_v38, %v491_v2  ;;  %v971_v2 = vld [vmem:[%s1828_s8 + $0x8] sm:$0xff] }
  0xf4   : > { %v1251_v39 = vpop.f32.mrf.mxu0 }
  0xf5   : > { %v651_v61 = vadd.f32 %v1251_v39, %v506_v58  ;;  %v707_v39 = vpop.permute.xlu0 %706 }
  0xf6   : > { %v645_v41 = vpop.f32.mrf.mxu0 }
  0xf7   : > { %v646_v62 = vadd.f32 %v645_v41, %v501_v60 }
  0xf8   : > { %v1254_v43 = vpop.f32.mrf.mxu0 }
  0xf9   : > { %v661_v57 = vadd.f32 %v1254_v43, %v516_v51 }
  0xfa   : > { %v655_v44 = vpop.f32.mrf.mxu0 }
  0xfb   : > { %v656_v59 = vadd.f32 %v655_v44, %v511_v55 }
  0xfc   : > { %v1257_v46 = vpop.f32.mrf.mxu0 }
  0xfd   : > { %v671_v53 = vadd.f32 %v1257_v46, %v526_v42  ;;  %v841_v46 = vld [vmem:[%s1826_s6 + $0x8] sm:$0xff] }
  0xfe   : > { %v665_v48 = vpop.f32.mrf.mxu0 }
  0xff   : > { %v666_v56 = vadd.f32 %v665_v48, %v521_v47  ;;  %v842_v47 = vld [vmem:[%s1826_s6 + $0x10] sm:$0xff]  ;;  %v843_v48 = vld [vmem:[%s1826_s6 + $0x18] sm:$0xff] }
 0x100   : > { %v1260_v49 = vpop.f32.mrf.mxu0 }
 0x101   : > { %v681_v50 = vadd.f32 %v1260_v49, %v536_v40  ;;  %v970_v49 = vld [vmem:[%s1828_s8] sm:$0xff] }
 0x102   : > { %v675_v52 = vpop.f32.mrf.mxu0 }
 0x103   : > { %1367 = vtanh.f32 %v681_v50  ;;  %v676_v54 = vadd.f32 %v675_v52, %v531_v45  ;;  %v866_v50 = vpop.permute.xlu1 %865  ;;  %v861_v52 = vpop.permute.xlu0 %860 }
 0x105   : > { %1369 = vtanh.f32 %v676_v54 }
 0x106   : > { %1371 = vtanh.f32 %v671_v53 }
 0x107   : > { %1373 = vtanh.f32 %v666_v56  ;;  %v856_v56 = vpop.permute.xlu1 %855  ;;  %v851_v60 = vpop.permute.xlu0 %850 }
 0x108   : > { %1375 = vtanh.f32 %v661_v57 }
 0x109   : > { %1377 = vtanh.f32 %v656_v59 }
 0x10a   : > { %1379 = vtanh.f32 %v651_v61 }
 0x10b   : > { %1381 = vtanh.f32 %v646_v62 }
 0x10c   : > { %1383 = vtanh.f32 %v641_v0 }
 0x10d   : > { %1385 = vtanh.f32 %v636_v3  ;;  %v982_v3 = vpop.permute.xlu0 %981 }
 0x110   : > { %v1368_v1 = vpop.eup %1367 }
 0x111   : > { %1262 = vmatpush3.msra.mxu1 %v1368_v1 }
 0x112   : > { %v1370_v6 = vpop.eup %1369  ;;  %1263 = vmatprep.subr.mxu1 %v1470_v36 }
 0x113   : > { %1264 = vmatpush3.msra.mxu1 %v1370_v6  ;;  %v1372_v7 = vpop.eup %1371 }
 0x114   : > { %1265 = vmatprep.subr.mxu1 %v1470_v36  ;;  %v1374_v8 = vpop.eup %1373 }
 0x115   : > { %1266 = vmatpush3.msra.mxu1 %v1372_v7  ;;  %v1376_v9 = vpop.eup %1375 }
 0x116   : > { %1267 = vmatprep.subr.mxu1 %v1470_v36  ;;  %v1378_v10 = vpop.eup %1377 }
 0x117   : > { %1268 = vmatpush3.msra.mxu1 %v1374_v8  ;;  %v1380_v11 = vpop.eup %1379  ;;  %v977_v8 = vpop.permute.xlu1 %976 }
 0x118   : > { %1269 = vmatprep.subr.mxu1 %v1470_v36  ;;  %v1382_v12 = vpop.eup %1381 }
 0x119   : > { %1270 = vmatpush3.msra.mxu1 %v1376_v9  ;;  %v1384_v13 = vpop.eup %1383 }
 0x11a   : > { %1271 = vmatprep.subr.mxu1 %v1470_v36  ;;  %v1386_v15 = vpop.eup %1385 }
 0x11b   : > { %1272 = vmatpush3.msra.mxu1 %v1378_v10 }
 0x11c   : > { %1273 = vmatprep.subr.mxu1 %v1470_v36 }
 0x11d   : > { %1274 = vmatpush3.msra.mxu1 %v1380_v11 }
 0x11e   : > { %1275 = vmatprep.subr.mxu1 %v1470_v36 }
 0x11f   : > { %1276 = vmatpush3.msra.mxu1 %v1382_v12 }
 0x120   : > { %1277 = vmatprep.subr.mxu1 %v1470_v36 }
 0x121   : > { %1278 = vmatpush3.msra.mxu1 %v1384_v13 }
 0x122   : > { %1279 = vmatprep.subr.mxu1 %v1470_v36 }
 0x123   : > { %1280 = vmatpush3.msra.mxu1 %v1386_v15 }
 0x124   : > { %1282 = vmatmul.mubr.msk.f32.vlgmr.msra.gmra.mxu1 %vm729_vm2, %v694_v14 }
 0x125   : > { %1284 = vmatprep.mubr.msk.f32.mxu1 %vm1471_vm1, %v1470_v36 }
 0x128   : > { %1285 = vmatmul.mubr.msk.f32.gmra.mxu1 %vm729_vm2, %v695_v16 }
 0x129   : > { %1287 = vmatprep.mubr.msk.f32.mxu1 %vm1471_vm1, %v1470_v36 }
 0x12c   : > { %1288 = vmatmul.mubr.msk.f32.gmra.mxu1 %vm729_vm2, %v696_v17 }
 0x12d   : > { %1290 = vmatprep.mubr.msk.f32.mxu1 %vm1471_vm1, %v1470_v36 }
 0x130   : > { %1291 = vmatmul.mubr.msk.f32.gmra.mxu1 %vm729_vm2, %v697_v18 }
 0x131   : > { %1293 = vmatprep.mubr.msk.f32.mxu1 %vm1471_vm1, %v1470_v36 }
 0x134   : > { %1294 = vmatmul.mubr.msk.f32.gmra.mxu1 %vm729_vm2, %v698_v19  ;;  %v1076_v19 = vstv %s1075_s20 }
 0x1e4   : > { %v811_v21 = vpop.f32.mrf.mxu1 }
 0x1e5   : > { %v812_v40 = vadd.f32 %v811_v21, %v707_v39  ;;  %v1079_v21 = vstv %s1078_s21  ;;  %s1097_s21 = scalar_lea.hbm %s1832_s12, %s1197_s13 }
 0x1e6   : > { %v1283_v22 = vpop.f32.mrf.mxu1 }
 0x1e8   : > { %v816_v23 = vpop.f32.mrf.mxu1 }
 0x1e9   : > { %v817_v38 = vadd.f32 %v816_v23, %v712_v37 }
 0x1ea   : > { %v1286_v24 = vpop.f32.mrf.mxu1 }
 0x1ec   : > { %v821_v25 = vpop.f32.mrf.mxu1 }
 0x1ed   : > { %v822_v36 = vadd.f32 %v821_v25, %v717_v31 }
 0x1ee   : > { %v1289_v27 = vpop.f32.mrf.mxu1 }
 0x1f0   : > { %v826_v28 = vpop.f32.mrf.mxu1 }
 0x1f1   : > { %v827_v33 = vadd.f32 %v826_v28, %v722_v29 }
 0x1f2   : > { %v1292_v30 = vpop.f32.mrf.mxu1 }
 0x1f4   : > { %v831_v32 = vpop.f32.mrf.mxu1 }
 0x1f5   : > { %v832_v34 = vadd.f32 %v831_v32, %v727_v26 }
 0x1f6   : > { %v1295_v35 = vpop.f32.mrf.mxu1 }
 0x1f7   : > { %1387 = vtanh.f32 %v832_v34 }
 0x1f8   : > { %1389 = vtanh.f32 %v827_v33 }
 0x1f9   : > { %1391 = vtanh.f32 %v822_v36 }
 0x1fa   : > { %1393 = vtanh.f32 %v817_v38 }
 0x1fb   : > { %1395 = vtanh.f32 %v812_v40 }
 0x204   : > { %v1388_v41 = vpop.eup %1387 }
 0x205   : > { %1296 = vmatprep.subr.mxu0 %v1388_v41  ;;  %v1390_v42 = vpop.eup %1389 }
 0x206   : > { %1297 = vmatpush3.msra.mxu0 %v1388_v41  ;;  %v1392_v43 = vpop.eup %1391 }
 0x207   : > { %1298 = vmatprep.subr.mxu0 %v1390_v42  ;;  %v1394_v44 = vpop.eup %1393 }
 0x208   : > { %1299 = vmatpush3.msra.mxu0 %v1390_v42  ;;  %v1396_v45 = vpop.eup %1395 }
 0x209   : > { %1300 = vmatprep.subr.mxu0 %v1392_v43 }
 0x20a   : > { %1301 = vmatpush3.msra.mxu0 %v1392_v43 }
 0x20b   : > { %1302 = vmatprep.subr.mxu0 %v1394_v44 }
 0x20c   : > { %1303 = vmatpush3.msra.mxu0 %v1394_v44 }
 0x20d   : > { %1304 = vmatprep.subr.mxu0 %v1396_v45 }
 0x20e   : > { %1305 = vmatpush3.msra.mxu0 %v1396_v45 }
 0x20f   : > { %1307 = vmatmul.mubr.msk.f32.vlgmr.msra.gmra.mxu0 %vm868_vm3, %v841_v46 }
 0x210   : > { %1309 = vmatprep.mubr.msk.f32.mxu0 %vm868_vm3, %v842_v47 }
 0x213   : > { %1310 = vmatmul.mubr.msk.f32.gmra.mxu0 %vm868_vm3, %v843_v48 }
 0x214   : > { %1320 = vmatprep.mubr.msk.f32.mxu0 %vm984_vm4, %v970_v49 }
 0x2cf   : > { %v1308_v51 = vpop.f32.mrf.mxu0 }
 0x2d0   : > { %v953_v58 = vadd.f32 %v1308_v51, %v856_v56 }
 0x2d1   : > { %v947_v53 = vpop.f32.mrf.mxu0 }
 0x2d2   : > { %v948_v61 = vadd.f32 %v947_v53, %v851_v60 }
 0x2d3   : > { %v1311_v54 = vpop.f32.mrf.mxu0 }
 0x2d4   : > { %v963_v55 = vadd.f32 %v1311_v54, %v866_v50 }
 0x2d5   : > { %v957_v57 = vpop.f32.mrf.mxu0 }
 0x2d6   : > { %1397 = vtanh.f32 %v963_v55  ;;  %v958_v59 = vadd.f32 %v957_v57, %v861_v52 }
 0x2d8   : > { %1399 = vtanh.f32 %v958_v59 }
 0x2d9   : > { %1401 = vtanh.f32 %v953_v58 }
 0x2da   : > { %1403 = vtanh.f32 %v948_v61 }
 0x2e3   : > { %v1398_v62 = vpop.eup %1397 }
 0x2e4   : > { %1312 = vmatprep.subr.mxu0 %v1398_v62 }
 0x2e5   : > { %v1400_v63 = vpop.eup %1399  ;;  %1313 = vmatpush3.msra.mxu0 %v1398_v62 }
 0x2e6   : > { %1314 = vmatprep.subr.mxu0 %v1400_v63  ;;  %v1402_v0 = vpop.eup %1401 }
 0x2e7   : > { %1315 = vmatpush3.msra.mxu0 %v1400_v63  ;;  %v1404_v1 = vpop.eup %1403 }
 0x2e8   : > { %1316 = vmatprep.subr.mxu0 %v1402_v0 }
 0x2e9   : > { %1317 = vmatpush3.msra.mxu0 %v1402_v0 }
 0x2ea   : > { %1318 = vmatprep.subr.mxu0 %v1404_v1 }
 0x2eb   : > { %1319 = vmatpush3.msra.mxu0 %v1404_v1 }
 0x2ec   : > { %1321 = vmatmul.mubr.msk.f32.vlgmr.msra.gmra.mxu0 %vm984_vm4, %v971_v2 }
 0x3ac   : > { %v1322_v6 = vpop.f32.mrf.mxu0 }
 0x3ad   : > { %v1063_v7 = vadd.f32 %v1322_v6, %v982_v3 }
 0x3ae   : > { %v1057_v9 = vpop.f32.mrf.mxu0 }
 0x3af   : > { %v1058_v10 = vadd.f32 %v1057_v9, %v977_v8  ;;  %v1067_v11 = vmul.f32 %v1063_v7, %v1607_v4 }
 0x3b1   : > { %v1066_v12 = vmul.f32 %v1058_v10, %v1609_v5  ;;  %v1083_v5 = vld [vmem:[%s465_s30] sm:$0x1] }
 0x3b3   : > { %v1068_v13 = vadd.f32 %v1067_v11, %v1066_v12 }
 0x3b5   : > { %v1069_v14 = vrot.slane %v1068_v13, 4 }
 0x3b7   : > { %v1070_v15 = vadd.f32 %v1069_v14, %v1068_v13 }
 0x3b9   : > { %v1071_v16 = vrot.slane %v1070_v15, 2 }
 0x3bb   : > { %v1072_v17 = vadd.f32 %v1071_v16, %v1070_v15 }
 0x3bd   : > { %v1073_v18 = vrot.slane %v1072_v17, 1 }
 0x3bf   : > { %v1074_v20 = vadd.f32 %v1073_v18, %v1072_v17 }
 0x3c1   : > { %v1077_v22 = vmul.f32 %v1076_v19, %v1074_v20 }
 0x3c3   : > { %v1080_v4 = vadd.f32 %v1079_v21, %v1077_v22 }
 0x3c5   : > { %v1081_v23 = vmul.f32 1.442695, %v1080_v4 }
 0x3c7   : > { %1405 = vpow2.f32 %v1081_v23 }
 0x3d4   : > { %v1406_v24 = vpop.eup %1405 }
 0x3d5   : > { %v1084_v25 = vmul.f32 %v1406_v24, %v1083_v5 }
 0x3d7   : > { %1085 = vst [vmem:[%s462_s17] sm:$0x1] %v1084_v25 }
 0x3d8   : > { %1420 = shalt.err (!%p1417_p7)
}
 0x3d9   : > { %s1421_s11 = scalar_lea.hbm %s1097_s21, 16  ;;  %s1425_s13 = scalar_lea.hbm %s1832_s12, 48 }
 0x3da   : > { %p1422_p9 = scmp.ne.s32.totalorder %s1097_s21, %s1421_s11  ;;  %p1426_p12 = scmp.lt.s32.totalorder %s1097_s21, %s1832_s12 }
 0x3db   : > { %p1427_p13 = scmp.lt.s32.totalorder %s1425_s13, %s1421_s11 }
 0x3dc   : > { %p1423_p10 = pnand %p1422_p9, %p1583_p6 }
 0x3dd   : > { %p1428_p0 = por %p1427_p13, %p1426_p12 }
 0x3de   : > { %p1424_p11 = pneg %p1423_p10 }
 0x3e0   : > { %p1429_p1 = pnand %p1428_p0, %p1424_p11 }
 0x3e2   : > { %1432 = shalt.err (!%p1429_p1)
}
 0x3e3   : > { %1323 = dma.vmem_to_hbm [thread:$0]  (%p1583_p6), %s1100_s18, 16, %s1097_s21, %s1087_s0  }
 0x3e4 PF: > { %p1329_p2 = scmp.ge.s32.totalorder %s1467_s28, 2  ;;  %s1111_s2 = sand.u32 1, %s1455_s25  }
 0x3e5   : > { %s1112_s20 = scalar_lea.sflag [#allocation6], %s1111_s2 }
 0x3e6   : > { %p1326_p3 = pnand %p1329_p2, %p1587_p8 }
 0x3e8   : > { %p1327_p4 = pneg %p1326_p3 }
 0x3ea   : > { %1450 = dma.done.wait (%p1327_p4), %s1112_s20, 16  }
 0x3eb   : > { %1452 = vsyncadd (%p1327_p4), %s1112_s20, 4294967280  ;;  %p24_p5 = scmp.ge.s32.totalorder %s1569_s29, 5   ;;  %s1839_s25 = smov %s1459_s26 }
 0x3ec   : > { %s1840_s26 = smov %s1463_s27  ;;  %s1841_s27 = smov %s1581_s14 }
 0x3ed   : > { %s1842_s28 = smov %s1569_s29  ;;  %26 = sbr.rel (!%p24_p5) target bundleno = 8 (0x8), region = 149 }
 0x3f2   :  { %1116 = vsyncpa [#allocation6], 1 }
 0x3f3   :  { %1118 = vsyncpa [#allocation6 + $0x1], 1 }

</bundles_post_ra>
